<compile_context>
chip_gen: v7x
topology: tpu7x:2x2x1
jax: 0.10.0
libtpu: 0.0.40
codegen_flags: <defaults>
</compile_context>

<pallas_src>
import functools

import jax
import jax.numpy as jnp
from jax import lax
from jax.experimental import pallas as pl
from jax.experimental.pallas import tpu as pltpu


def _round_up(n, m):
    return ((n + m - 1) // m) * m


def _pad_axis(a, axis, target):
    pad = target - a.shape[axis]
    if pad == 0:
        return a
    widths = [(0, 0)] * a.ndim
    widths[axis] = (0, pad)
    return jnp.pad(a, widths)


def _gelu(h, approximate):
    if approximate:
        # tanh approximation -> transcendental routed to the EUP slot.
        return jax.nn.gelu(h, approximate=True)
    # Exact GELU (nn.GELU() default): 0.5 * h * (1 + erf(h / sqrt(2)))
    return 0.5 * h * (1.0 + lax.erf(h * 0.7071067811865476))


def _ffn_resident_kernel(x_ref, w1_ref, b1_ref, w2_ref, b2_ref, o_ref, *,
                         approximate_gelu):
    """Whole-FFN tile: W1/W2 fully VMEM-resident, grid only over token tiles."""
    h = jnp.dot(x_ref[...], w1_ref[...], preferred_element_type=jnp.float32)
    h = _gelu(h + b1_ref[...].astype(jnp.float32), approximate_gelu)
    out = jnp.dot(h.astype(w2_ref.dtype), w2_ref[...],
                  preferred_element_type=jnp.float32)
    # Dropout: identity in eval mode.
    # TODO(synk): training-mode dropout (pltpu.prng_random_bits mask) not emitted.
    o_ref[...] = (out + b2_ref[...].astype(jnp.float32)).astype(o_ref.dtype)


def _ffn_stream_kernel(x_ref, w1_ref, b1_ref, w2_ref, b2_ref, o_ref, *scratch,
                       approximate_gelu):
    """I-streaming path: accumulate gelu(x@W1+b1)@W2 over the intermediate axis."""
    # f32 outputs accumulate directly into the resident output block (its block
    # index ignores the i axis); other output dtypes use the f32 VMEM scratch.
    acc_ref = scratch[0] if scratch else o_ref
    i = pl.program_id(1)

    @pl.when(i == 0)
    def _():
        acc_ref[...] = jnp.zeros_like(acc_ref)

    h = jnp.dot(x_ref[...], w1_ref[...], preferred_element_type=jnp.float32)
    h = _gelu(h + b1_ref[...].astype(jnp.float32), approximate_gelu)
    acc_ref[...] += jnp.dot(h.astype(w2_ref.dtype), w2_ref[...],
                            preferred_element_type=jnp.float32)

    @pl.when(i == pl.num_programs(1) - 1)
    def _():
        # Dropout: identity in eval mode.
        o_ref[...] = (acc_ref[...] + b2_ref[...].astype(jnp.float32)).astype(o_ref.dtype)


def _vmem_budget(vmem_limit_bytes):
    """(vmem_limit_bytes for the compiler, planning budget for our buffers)."""
    if vmem_limit_bytes is None:
        try:
            cap = int(pltpu.get_tpu_info().vmem_capacity_bytes)
        except Exception:
            cap = 64 * 1024 * 1024  # conservative: v7x per-TC VMEM
        # Leave headroom for compiler temps; cap at 96 MiB on 128 MiB parts.
        vmem_limit_bytes = max(32 * 1024 * 1024,
                               min(cap - 16 * 1024 * 1024, 96 * 1024 * 1024))
    return int(vmem_limit_bytes), int(vmem_limit_bytes * 0.85)


def _select_tiles(m_aligned, Hp, Ip, x_isz, w_isz, o_isz, budget, weight_resident):
    """Choose (resident?, tile_m, tile_i) under the VMEM planning budget."""

    def resident_bytes(tm):
        return (4 * Hp * Ip * w_isz            # W1 + W2 (double-buffer budget)
                + 2 * tm * Hp * x_isz          # x tile (double-buffered)
                + 2 * tm * Hp * o_isz          # out tile (double-buffered)
                + tm * Ip * (4 + w_isz)        # f32 intermediate + cast copy
                + 4 * (Ip + Hp) * 4)           # biases

    def stream_bytes(tm, ti):
        b = (4 * Hp * ti * w_isz               # W1/W2 blocks (double-buffered)
             + 2 * tm * Hp * x_isz
             + 2 * tm * Hp * o_isz
             + tm * ti * (4 + w_isz)
             + 4 * (ti + Hp) * 4)
        if o_isz != 4:                         # separate f32 accumulator
            b += tm * Hp * 4
        return b

    tm_cands = sorted({c for c in (1024, 512, 256, 128, 64, 32, 16)
                       if c <= m_aligned} | {m_aligned}, reverse=True)

    if weight_resident is None:
        use_resident = resident_bytes(min(128, m_aligned)) <= budget
    elif weight_resident:
        use_resident = resident_bytes(16) <= budget
    else:
        use_resident = False

    if use_resident:
        tm = next(c for c in tm_cands if resident_bytes(c) <= budget)
        # v7x megacore: keep >= 2 token tiles when there is enough work so both
        # TensorCores get a share of the "parallel" M axis.
        if -(-m_aligned // tm) < 2 and m_aligned >= 32:
            tm = min(tm, _round_up(m_aligned // 2, 16))
        return True, tm, Ip

    ti_cands = sorted({c for c in (2048, 1024, 512, 256, 128) if c <= Ip},
                      reverse=True)
    for tm in tm_cands:          # prefer large tm first (weight-stream amortization)
        for ti in ti_cands:      # then large ti (fewer grid steps / DMA issues)
            if stream_bytes(tm, ti) <= budget:
                return False, tm, ti
    return False, 16, 128


def feed_forward(x, w1, b1, w2, b2, *, approximate_gelu=False, bf16_matmul=False,
                 weight_resident=None, tile_m=None, tile_i=None,
                 vmem_limit_bytes=None):
    """x: [B, S, H]; w1: [H, I]; b1: [I]; w2: [I, H]; b2: [H] -> [B, S, H].

    Weights are stored pre-transposed ([in, out], i.e. PyTorch W^T).  Dropout
    follows eval semantics (identity).
    """
    B, S, H = x.shape
    Hin, I = w1.shape
    assert Hin == H and w2.shape == (I, H) and b1.shape == (I,) and b2.shape == (H,)
    out_dtype = x.dtype
    M = B * S

    if bf16_matmul and x.dtype == jnp.float32:
        # bf16 MXU operands with f32 accumulation: ~2x MXU throughput and half
        # the weight HBM/VMEM bytes at negligible FFN accuracy cost.
        x = x.astype(jnp.bfloat16)
        w1 = w1.astype(jnp.bfloat16)
        w2 = w2.astype(jnp.bfloat16)

    Hp = _round_up(H, 128)           # lane-dense loads / unmasked stores
    Ip = _round_up(I, 128)
    m_aligned = _round_up(M, 16)     # 16-row granule keeps bf16 sublane packing legal

    x_isz = jnp.dtype(x.dtype).itemsize
    w_isz = jnp.dtype(w1.dtype).itemsize
    o_isz = jnp.dtype(out_dtype).itemsize

    vmem_limit, budget = _vmem_budget(vmem_limit_bytes)
    resident, tm, ti = _select_tiles(m_aligned, Hp, Ip, x_isz, w_isz, o_isz,
                                     budget, weight_resident)
    if tile_m is not None:
        tm = _round_up(min(tile_m, m_aligned), 16)
    if tile_i is not None and not resident:
        ti = _round_up(min(tile_i, Ip), 128)

    Mp = _round_up(M, tm)
    Ip2 = Ip if resident else _round_up(Ip, ti)

    # Zero padding preserves semantics: padded H/I columns contribute 0
    # (gelu(0) = 0 and padded biases are 0); padded M rows and padded output
    # columns are sliced off below.  Pads are no-ops for aligned (BERT) shapes.
    x2 = _pad_axis(_pad_axis(x.reshape(M, H), 1, Hp), 0, Mp)
    w1p = _pad_axis(_pad_axis(w1, 0, Hp), 1, Ip2)
    b1p = _pad_axis(b1, 0, Ip2).reshape(1, Ip2)
    w2p = _pad_axis(_pad_axis(w2, 0, Ip2), 1, Hp)
    b2p = _pad_axis(b2, 0, Hp).reshape(1, Hp)

    n_m = Mp // tm
    w_stream_passes = 1 if resident else n_m
    cost = pl.CostEstimate(
        flops=int(4 * Mp * Hp * Ip2),
        transcendentals=int(Mp * Ip2) if approximate_gelu else 0,
        bytes_accessed=int(Mp * Hp * (x_isz + o_isz)
                           + w_stream_passes * 2 * Hp * Ip2 * w_isz
                           + (Ip2 + Hp) * 4),
    )

    if resident:
        kernel = functools.partial(_ffn_resident_kernel,
                                   approximate_gelu=approximate_gelu)
        grid_spec = pltpu.PrefetchScalarGridSpec(
            num_scalar_prefetch=0,
            grid=(n_m,),
            in_specs=[
                pl.BlockSpec((tm, Hp), lambda m: (m, 0)),    # x tile
                pl.BlockSpec((Hp, Ip2), lambda m: (0, 0)),   # W1 (fetched once)
                pl.BlockSpec((1, Ip2), lambda m: (0, 0)),    # b1 (fetched once)
                pl.BlockSpec((Ip2, Hp), lambda m: (0, 0)),   # W2 (fetched once)
                pl.BlockSpec((1, Hp), lambda m: (0, 0)),     # b2 (fetched once)
            ],
            out_specs=pl.BlockSpec((tm, Hp), lambda m: (m, 0)),
            scratch_shapes=[],
        )
        dim_sem = ("parallel",)
    else:
        kernel = functools.partial(_ffn_stream_kernel,
                                   approximate_gelu=approximate_gelu)
        scratch = [] if o_isz == 4 else [pltpu.VMEM((tm, Hp), jnp.float32)]
        grid_spec = pltpu.PrefetchScalarGridSpec(
            num_scalar_prefetch=0,
            grid=(n_m, Ip2 // ti),
            in_specs=[
                pl.BlockSpec((tm, Hp), lambda m, i: (m, 0)),   # x tile
                pl.BlockSpec((Hp, ti), lambda m, i: (0, i)),   # W1 block
                pl.BlockSpec((1, ti), lambda m, i: (0, i)),    # b1 block
                pl.BlockSpec((ti, Hp), lambda m, i: (i, 0)),   # W2 block
                pl.BlockSpec((1, Hp), lambda m, i: (0, 0)),    # b2
            ],
            out_specs=pl.BlockSpec((tm, Hp), lambda m, i: (m, 0)),
            scratch_shapes=scratch,
        )
        dim_sem = ("parallel", "arbitrary")

    out = pl.pallas_call(
        kernel,
        out_shape=jax.ShapeDtypeStruct((Mp, Hp), out_dtype),
        grid_spec=grid_spec,
        compiler_params=pltpu.CompilerParams(
            dimension_semantics=dim_sem,
            vmem_limit_bytes=int(vmem_limit),
        ),
        cost_estimate=cost,
    )(x2, w1p, b1p, w2p, b2p)

    return out[:M, :H].reshape(B, S, H)


def _reference(x, w1, b1, w2, b2):
    h = x @ w1 + b1
    h = 0.5 * h * (1.0 + lax.erf(h / jnp.sqrt(2.0)))
    return h @ w2 + b2


if __name__ == "__main__":
    # Small config consistent with the module: hidden_size=32, intermediate_size=128,
    # batch=2, seq=8 (dropout prob irrelevant in eval).
    B, S, H, I = 2, 8, 32, 128

    key = jax.random.PRNGKey(0)
    kx, k1, k2, k3, k4 = jax.random.split(key, 5)

    x = jax.random.normal(kx, (B, S, H), dtype=jnp.float32)
    # Deterministic parameter init (weights stored as [in, out], i.e. W^T of PyTorch).
    w1 = jax.random.normal(k1, (H, I), dtype=jnp.float32) * 0.02
    b1 = jax.random.normal(k2, (I,), dtype=jnp.float32) * 0.02
    w2 = jax.random.normal(k3, (I, H), dtype=jnp.float32) * 0.02
    b2 = jax.random.normal(k4, (H,), dtype=jnp.float32) * 0.02

    y_ref = _reference(x, w1, b1, w2, b2)

    # 1) f32, auto (weight-resident) path, exact erf GELU — nn.GELU() parity.
    y = jax.block_until_ready(feed_forward(x, w1, b1, w2, b2))
    assert y.shape == (B, S, H)
    assert jnp.allclose(y, y_ref, atol=1e-5, rtol=1e-5)

    # 2) Forced I-streaming path (exercises the in-place f32 accumulator kernel).
    y_s = jax.block_until_ready(feed_forward(x, w1, b1, w2, b2,
                                             weight_resident=False))
    assert jnp.allclose(y_s, y_ref, atol=1e-5, rtol=1e-5)

    # 3) bf16 inputs/weights, streaming path (exercises the f32 scratch accumulator).
    xb, w1b, b1b, w2b, b2b = (a.astype(jnp.bfloat16) for a in (x, w1, b1, w2, b2))
    yb = jax.block_until_ready(feed_forward(xb, w1b, b1b, w2b, b2b,
                                            weight_resident=False))
    assert yb.dtype == jnp.bfloat16
    assert jnp.allclose(yb.astype(jnp.float32), y_ref, atol=5e-2, rtol=5e-2)

    # 4) f32 inputs with bf16 MXU operands (f32 accumulation, f32 output).
    ybm = jax.block_until_ready(feed_forward(x, w1, b1, w2, b2, bf16_matmul=True))
    assert ybm.dtype == jnp.float32
    assert jnp.allclose(ybm, y_ref, atol=5e-2, rtol=5e-2)

    print("KERNEL_OK")
</pallas_src>

<mosaic_0001>
module attributes {stable_mosaic.version = 11 : i64} {
  func.func @_ffn_resident_kernel(%arg0: i32, %arg1: memref<16x128xf32, #tpu.memory_space<vmem>>, %arg2: memref<128x128xf32, #tpu.memory_space<vmem>>, %arg3: memref<1x128xf32, #tpu.memory_space<vmem>>, %arg4: memref<128x128xf32, #tpu.memory_space<vmem>>, %arg5: memref<1x128xf32, #tpu.memory_space<vmem>>, %arg6: memref<16x128xf32, #tpu.memory_space<vmem>>) attributes {dimension_semantics = [#tpu.dimension_semantics<parallel>], iteration_bounds = array<i64: 1>, scalar_prefetch = 0 : i64, scratch_operands = 0 : i64, tpu.core_type = #tpu.core_type<tc>, window_params = [{transform_indices = @transform_0, window_bounds = array<i64: 16, 128>}, {pipeline_mode = #tpu.pipeline_mode<synchronous>, transform_indices = @transform_1, window_bounds = array<i64: 128, 128>}, {pipeline_mode = #tpu.pipeline_mode<synchronous>, transform_indices = @transform_2, window_bounds = array<i64: 1, 128>}, {pipeline_mode = #tpu.pipeline_mode<synchronous>, transform_indices = @transform_3, window_bounds = array<i64: 128, 128>}, {pipeline_mode = #tpu.pipeline_mode<synchronous>, transform_indices = @transform_4, window_bounds = array<i64: 1, 128>}, {transform_indices = @transform_5, window_bounds = array<i64: 16, 128>}]} {
    %c0 = arith.constant 0 : index
    %c0_0 = arith.constant 0 : index
    %0 = vector.load %arg1[%c0, %c0_0] : memref<16x128xf32, #tpu.memory_space<vmem>>, vector<16x128xf32>
    %c0_1 = arith.constant 0 : index
    %c0_2 = arith.constant 0 : index
    %1 = vector.load %arg2[%c0_1, %c0_2] : memref<128x128xf32, #tpu.memory_space<vmem>>, vector<128x128xf32>
    %cst = arith.constant dense<0.000000e+00> : vector<16x128xf32>
    %2 = tpu.matmul %0, %1, %cst {dimension_numbers = #tpu.dot_dimension_numbers<[1], [0], [0], [1], [0, 0, 1, 1], [], []>} : vector<16x128xf32>, vector<128x128xf32>, vector<16x128xf32> -> vector<16x128xf32>
    %c0_3 = arith.constant 0 : index
    %c0_4 = arith.constant 0 : index
    %3 = vector.load %arg3[%c0_3, %c0_4] : memref<1x128xf32, #tpu.memory_space<vmem>>, vector<1x128xf32>
    %4 = vector.broadcast %3 : vector<1x128xf32> to vector<16x128xf32>
    %5 = arith.addf %2, %4 : vector<16x128xf32>
    %cst_5 = arith.constant 5.000000e-01 : f32
    %6 = vector.broadcast %cst_5 : f32 to vector<16x128xf32>
    %7 = arith.mulf %6, %5 : vector<16x128xf32>
    %cst_6 = arith.constant 0.707106769 : f32
    %8 = vector.broadcast %cst_6 : f32 to vector<16x128xf32>
    %9 = arith.mulf %5, %8 : vector<16x128xf32>
    %10 = math.erf %9 : vector<16x128xf32>
    %cst_7 = arith.constant 1.000000e+00 : f32
    %11 = vector.broadcast %cst_7 : f32 to vector<16x128xf32>
    %12 = arith.addf %11, %10 : vector<16x128xf32>
    %13 = arith.mulf %7, %12 : vector<16x128xf32>
    %c0_8 = arith.constant 0 : index
    %c0_9 = arith.constant 0 : index
    %14 = vector.load %arg4[%c0_8, %c0_9] : memref<128x128xf32, #tpu.memory_space<vmem>>, vector<128x128xf32>
    %cst_10 = arith.constant dense<0.000000e+00> : vector<16x128xf32>
    %15 = tpu.matmul %13, %14, %cst_10 {dimension_numbers = #tpu.dot_dimension_numbers<[1], [0], [0], [1], [0, 0, 1, 1], [], []>} : vector<16x128xf32>, vector<128x128xf32>, vector<16x128xf32> -> vector<16x128xf32>
    %c0_11 = arith.constant 0 : index
    %c0_12 = arith.constant 0 : index
    %16 = vector.load %arg5[%c0_11, %c0_12] : memref<1x128xf32, #tpu.memory_space<vmem>>, vector<1x128xf32>
    %17 = vector.broadcast %16 : vector<1x128xf32> to vector<16x128xf32>
    %18 = arith.addf %15, %17 : vector<16x128xf32>
    %c0_13 = arith.constant 0 : index
    %c0_14 = arith.constant 0 : index
    %19 = vector.load %arg6[%c0_13, %c0_14] : memref<16x128xf32, #tpu.memory_space<vmem>>, vector<16x128xf32>
    tpu.vector_store %arg6[%c0_13, %c0_14], %18 {strides = array<i32>} : memref<16x128xf32, #tpu.memory_space<vmem>>, vector<16x128xf32>,
    return
  }
  func.func @transform_0(%arg0: i32) -> (i32, i32) {
    %c0_i32 = arith.constant 0 : i32
    %c0_i32_0 = arith.constant 0 : i32
    return %arg0, %c0_i32 : i32, i32
  }
  func.func @transform_1(%arg0: i32) -> (i32, i32) {
    %c0_i32 = arith.constant 0 : i32
    %c0_i32_0 = arith.constant 0 : i32
    %c0_i32_1 = arith.constant 0 : i32
    return %c0_i32, %c0_i32_0 : i32, i32
  }
  func.func @transform_2(%arg0: i32) -> (i32, i32) {
    %c0_i32 = arith.constant 0 : i32
    %c0_i32_0 = arith.constant 0 : i32
    %c0_i32_1 = arith.constant 0 : i32
    return %c0_i32, %c0_i32_0 : i32, i32
  }
  func.func @transform_3(%arg0: i32) -> (i32, i32) {
    %c0_i32 = arith.constant 0 : i32
    %c0_i32_0 = arith.constant 0 : i32
    %c0_i32_1 = arith.constant 0 : i32
    return %c0_i32, %c0_i32_0 : i32, i32
  }
  func.func @transform_4(%arg0: i32) -> (i32, i32) {
    %c0_i32 = arith.constant 0 : i32
    %c0_i32_0 = arith.constant 0 : i32
    %c0_i32_1 = arith.constant 0 : i32
    return %c0_i32, %c0_i32_0 : i32, i32
  }
  func.func @transform_5(%arg0: i32) -> (i32, i32) {
    %c0_i32 = arith.constant 0 : i32
    %c0_i32_0 = arith.constant 0 : i32
    return %arg0, %c0_i32 : i32, i32
  }
}

</mosaic_0001>

<bundles_post_ra>
// kernel: tpu_custom_call.1
= control target key start
LH: loop header
LB: loop body
LE: loop exit
PB: predicated region body
PF: predicated region fallthrough
CT: control target
= control target key end

     0   :  { %10 = vsyncpa [#allocation3], 0  ;;  %s675_s0 = inlined_call_operand.hbm [shape: f32[16,128], index: 0, kind: input, shape index: {}]   ;;  %s676_s1 = inlined_call_operand.hbm [shape: f32[128,128], index: 1, kind: input, shape index: {}]   ;;  %s677_s2 = inlined_call_operand.vmem [shape: f32[1,128], index: 2, kind: input, shape index: {}]   ;;  %s678_s3 = inlined_call_operand.hbm [shape: f32[128,128], index: 3, kind: input, shape index: {}]   ;;  %s679_s4 = inlined_call_operand.vmem [shape: f32[1,128], index: 4, kind: input, shape index: {}]   ;;  %s680_s5 = inlined_call_operand.hbm [shape: f32[16,128], index: 5, kind: output, shape index: {}]  }
   0x1   :  { %11 = vsyncpa [#allocation6], 0 }
   0x2   :  { %12 = vsyncpa [#allocation4], 0  ;;  %s566_s18 = smov [#allocation5]   ;;  %s567_s20 = smov [#allocation2]  }
   0x3   :  { %s30_s19 = sshll.u32 %s566_s18, 4  ;;  %s18_s21 = sshll.u32 %s567_s20, 4  ;;  %s31_s19 = int_to_ptr.vmem [resolvable:$true] %s30_s19  ;;  %s602_s21 = int_to_ptr.vmem [resolvable:$true] %s18_s21 }
   0x4   :  { %s472_s24 = scalar_lea.hbm %s676_s1, 2048 }
   0x5   :  { %p473_p0 = scmp.ne.s32.totalorder %s676_s1, %s472_s24  ;;  %p476_p1 = scmp.lt.u32.totalorder %s472_s24, %s676_s1 }
   0x7   :  { %p478_p2 = pnand %p476_p1, %p473_p0 }
   0x9   :  { %481 = shalt.err (!%p478_p2)
}
   0xa   :  { %s482_s29 = scalar_lea.vmem %s31_s19, 2048  ;;  %p487_p4 = scmp.lt.s32.totalorder %s31_s19, %s31_s19 }
   0xb   :  { %p483_p3 = scmp.ne.s32.totalorder %s31_s19, %s482_s29  ;;  %p488_p5 = scmp.lt.s32.totalorder %s482_s29, %s482_s29 }
   0xd   :  { %p489_p6 = por %p488_p5, %p487_p4 }
   0xf   :  { %p490_p7 = pnand %p489_p6, %p483_p3 }
  0x11   :  { %493 = shalt.err (!%p490_p7)
}
  0x12   :  { %s568_s30 = smov 128   ;;  %s569_s6 = smov 8  }
  0x13   :  { %36 = dma.hbm_to_vmem [thread:$0]  %s676_s1, 2048, %s31_s19, [#allocation6], %s568_s30, %s568_s30, %s569_s6  }
  0x14   :  { %s494_s11 = scalar_lea.hbm %s675_s0, 256 }
  0x15   :  { %p495_p8 = scmp.ne.s32.totalorder %s675_s0, %s494_s11  ;;  %p498_p9 = scmp.lt.u32.totalorder %s494_s11, %s675_s0 }
  0x17   :  { %p500_p10 = pnand %p498_p9, %p495_p8 }
  0x19   :  { %503 = shalt.err (!%p500_p10)
}
  0x1a   :  { %s504_s16 = scalar_lea.vmem %s602_s21, 256  ;;  %p509_p12 = scmp.lt.s32.totalorder %s602_s21, %s602_s21 }
  0x1b   :  { %p505_p11 = scmp.ne.s32.totalorder %s602_s21, %s504_s16  ;;  %p510_p13 = scmp.lt.s32.totalorder %s504_s16, %s504_s16 }
  0x1d   :  { %p511_p0 = por %p510_p13, %p509_p12 }
  0x1f   :  { %p512_p1 = pnand %p511_p0, %p505_p11 }
  0x21   :  { %515 = shalt.err (!%p512_p1)
}
  0x22   :  { %24 = dma.hbm_to_vmem [thread:$0]  %s675_s0, 256, %s602_s21, [#allocation3], %s568_s30, %s568_s30, %s569_s6  }
  0x23   :  { %s570_s18 = smov [#allocation7]   ;;  %s516_s23 = scalar_lea.hbm %s678_s3, 2048 }
  0x24   :  { %s44_s19 = sshll.u32 %s570_s18, 4  ;;  %p517_p2 = scmp.ne.s32.totalorder %s678_s3, %s516_s23  ;;  %s45_s19 = int_to_ptr.vmem [resolvable:$true] %s44_s19 }
  0x25   :  { %p520_p3 = scmp.lt.u32.totalorder %s516_s23, %s678_s3 }
  0x27   :  { %p522_p4 = pnand %p520_p3, %p517_p2 }
  0x29   :  { %525 = shalt.err (!%p522_p4)
}
  0x2a   :  { %s526_s28 = scalar_lea.vmem %s45_s19, 2048  ;;  %p531_p6 = scmp.lt.s32.totalorder %s45_s19, %s45_s19 }
  0x2b   :  { %p527_p5 = scmp.ne.s32.totalorder %s45_s19, %s526_s28  ;;  %p532_p7 = scmp.lt.s32.totalorder %s526_s28, %s526_s28 }
  0x2d   :  { %p533_p8 = por %p532_p7, %p531_p6 }
  0x2f   :  { %p534_p9 = pnand %p533_p8, %p527_p5 }
  0x31   :  { %537 = shalt.err (!%p534_p9)
}
  0x32   :  { %50 = dma.hbm_to_vmem [thread:$0]  %s678_s3, 2048, %s45_s19, [#allocation6], %s568_s30, %s568_s30, %s569_s6  }
  0x33   :  { %560 = dma.done.wait [#allocation3], 256  }
  0x34   :  { %561 = vsyncadd [#allocation3], 4294967040 }
  0x35   :  { %562 = dma.done.wait [#allocation6], 4096  }
  0x36   :  { %563 = vsyncadd [#allocation6], 4294963200  ;;  %v64_v0 = vld [vmem:[#allocation5] sm:$0xff]  ;;  %v65_v1 = vld [vmem:[#allocation5 + $0x8] sm:$0xff]  ;;  %s571_s8 = smov [#allocation8]  }
  0x37   :  { %v66_v2 = vld [vmem:[#allocation5 + $0x10] sm:$0xff]  ;;  %v398_v3 = vpack.c.bf16 %v65_v1, %v64_v0  ;;  %v67_v4 = vld [vmem:[#allocation5 + $0x18] sm:$0xff]  ;;  %v68_v6 = vld [vmem:[#allocation5 + $0x20] sm:$0xff]  ;;  %s277_s9 = sshll.u32 %s571_s8, 4  ;;  %s278_s9 = int_to_ptr.vmem [resolvable:$true] %s277_s9 }
  0x38   :  { %v402_v5 = vpack.c.bf16 %v67_v4, %v66_v2  ;;  %v69_v7 = vld [vmem:[#allocation5 + $0x28] sm:$0xff]  ;;  %v70_v9 = vld [vmem:[#allocation5 + $0x30] sm:$0xff]  ;;  %v71_v10 = vld [vmem:[#allocation5 + $0x38] sm:$0xff]  ;;  %s538_s10 = scalar_lea.vmem %s278_s9, 256  ;;  %p543_p11 = scmp.lt.s32.totalorder %s278_s9, %s278_s9 }
  0x39   :  { %399 = vmatprep.subr.bf16.mxu0 %v398_v3  ;;  %v406_v8 = vpack.c.bf16 %v69_v7, %v68_v6  ;;  %v62_v11 = vld [vmem:[#allocation2] sm:$0xff]  ;;  %v172_v12 = vld [vmem:[#allocation7] sm:$0xff]  ;;  %v173_v13 = vld [vmem:[#allocation7 + $0x8] sm:$0xff]  ;;  %v410_v20 = vpack.c.bf16 %v71_v10, %v70_v9  ;;  %p539_p10 = scmp.ne.s32.totalorder %s278_s9, %s538_s10  ;;  %p544_p12 = scmp.lt.s32.totalorder %s538_s10, %s538_s10 }
  0x3a   :  { %401 = vmatpush3.bf16.msra.mxu0 %v398_v3  ;;  %360 = vmatprep.mubr.f32.mxu0 %v62_v11  ;;  %v174_v14 = vld [vmem:[#allocation7 + $0x10] sm:$0xff]  ;;  %v430_v15 = vpack.c.bf16 %v173_v13, %v172_v12  ;;  %v175_v16 = vld [vmem:[#allocation7 + $0x18] sm:$0xff]  ;;  %v176_v18 = vld [vmem:[#allocation7 + $0x20] sm:$0xff] }
  0x3b   :  { %403 = vmatprep.subr.bf16.mxu0 %v402_v5  ;;  %v434_v17 = vpack.c.bf16 %v175_v16, %v174_v14  ;;  %v177_v19 = vld [vmem:[#allocation7 + $0x28] sm:$0xff]  ;;  %v72_v21 = vld [vmem:[#allocation5 + $0x40] sm:$0xff]  ;;  %v74_v25 = vld [vmem:[#allocation5 + $0x50] sm:$0xff]  ;;  %p545_p13 = por %p544_p12, %p543_p11 }
  0x3c   :  { %431 = vmatprep.subr.bf16.mxu1 %v430_v15  ;;  %v73_v22 = vld [vmem:[#allocation5 + $0x48] sm:$0xff]  ;;  %v438_v23 = vpack.c.bf16 %v177_v19, %v176_v18  ;;  %v75_v26 = vld [vmem:[#allocation5 + $0x58] sm:$0xff]  ;;  %v76_v28 = vld [vmem:[#allocation5 + $0x60] sm:$0xff] }
  0x3d   :  { %433 = vmatpush3.bf16.msra.mxu1 %v430_v15  ;;  %v414_v24 = vpack.c.bf16 %v73_v22, %v72_v21  ;;  %v418_v27 = vpack.c.bf16 %v75_v26, %v74_v25  ;;  %v77_v29 = vld [vmem:[#allocation5 + $0x68] sm:$0xff]  ;;  %v78_v31 = vld [vmem:[#allocation5 + $0x70] sm:$0xff]  ;;  %v79_v32 = vld [vmem:[#allocation5 + $0x78] sm:$0xff]  ;;  %p546_p0 = pnand %p545_p13, %p539_p10 }
  0x3e   :  { %405 = vmatpush3.bf16.msra.mxu0 %v402_v5  ;;  %435 = vmatprep.subr.bf16.mxu1 %v434_v17  ;;  %v422_v30 = vpack.c.bf16 %v77_v29, %v76_v28  ;;  %v426_v33 = vpack.c.bf16 %v79_v32, %v78_v31  ;;  %v63_v34 = vld [vmem:[#allocation2 + $0x8] sm:$0xff]  ;;  %v178_v35 = vld [vmem:[#allocation7 + $0x30] sm:$0xff]  ;;  %v180_v38 = vld [vmem:[#allocation7 + $0x40] sm:$0xff] }
  0x3f   :  { %407 = vmatprep.subr.bf16.mxu0 %v406_v8  ;;  %v179_v36 = vld [vmem:[#allocation7 + $0x38] sm:$0xff]  ;;  %v181_v39 = vld [vmem:[#allocation7 + $0x48] sm:$0xff]  ;;  %v182_v41 = vld [vmem:[#allocation7 + $0x50] sm:$0xff] }
  0x40   :  { %v442_v37 = vpack.c.bf16 %v179_v36, %v178_v35  ;;  %v446_v40 = vpack.c.bf16 %v181_v39, %v180_v38  ;;  %v183_v42 = vld [vmem:[#allocation7 + $0x58] sm:$0xff]  ;;  %v184_v44 = vld [vmem:[#allocation7 + $0x60] sm:$0xff]  ;;  %v185_v45 = vld [vmem:[#allocation7 + $0x68] sm:$0xff] }
  0x41   :  { %437 = vmatpush3.bf16.msra.mxu1 %v434_v17  ;;  %v450_v43 = vpack.c.bf16 %v183_v42, %v182_v41  ;;  %v454_v46 = vpack.c.bf16 %v185_v45, %v184_v44  ;;  %v186_v47 = vld [vmem:[#allocation7 + $0x70] sm:$0xff]  ;;  %v187_v48 = vld [vmem:[#allocation7 + $0x78] sm:$0xff] }
  0x42   :  { %409 = vmatpush3.bf16.msra.mxu0 %v406_v8  ;;  %439 = vmatprep.subr.bf16.mxu1 %v438_v23  ;;  %v458_v49 = vpack.c.bf16 %v187_v48, %v186_v47  ;;  %v290_v50 = vld [vmem:[%s677_s2] ss:$0 sm:$0xff] }
  0x43   :  { %411 = vmatprep.subr.bf16.mxu0 %v410_v20  ;;  %v291_v1 = vld [vmem:[%s679_s4] ss:$0 sm:$0xff] }
  0x45   :  { %441 = vmatpush3.bf16.msra.mxu1 %v438_v23 }
  0x46   :  { %413 = vmatpush3.bf16.msra.mxu0 %v410_v20  ;;  %443 = vmatprep.subr.bf16.mxu1 %v442_v37 }
  0x47   :  { %415 = vmatprep.subr.bf16.mxu0 %v414_v24 }
  0x49   :  { %445 = vmatpush3.bf16.msra.mxu1 %v442_v37 }
  0x4a   :  { %417 = vmatpush3.bf16.msra.mxu0 %v414_v24  ;;  %447 = vmatprep.subr.bf16.mxu1 %v446_v40 }
  0x4b   :  { %419 = vmatprep.subr.bf16.mxu0 %v418_v27 }
  0x4d   :  { %449 = vmatpush3.bf16.msra.mxu1 %v446_v40 }
  0x4e   :  { %421 = vmatpush3.bf16.msra.mxu0 %v418_v27  ;;  %451 = vmatprep.subr.bf16.mxu1 %v450_v43 }
  0x4f   :  { %423 = vmatprep.subr.bf16.mxu0 %v422_v30 }
  0x51   :  { %453 = vmatpush3.bf16.msra.mxu1 %v450_v43 }
  0x52   :  { %425 = vmatpush3.bf16.msra.mxu0 %v422_v30  ;;  %455 = vmatprep.subr.bf16.mxu1 %v454_v46 }
  0x53   :  { %427 = vmatprep.subr.bf16.mxu0 %v426_v33 }
  0x55   :  { %457 = vmatpush3.bf16.msra.mxu1 %v454_v46 }
  0x56   :  { %429 = vmatpush3.bf16.msra.mxu0 %v426_v33  ;;  %459 = vmatprep.subr.bf16.mxu1 %v458_v49 }
  0x59   :  { %361 = vmatmul.mubr.f32.vlgmr.msra.gmra.mrb[0].mxu0 %v63_v34  ;;  %461 = vmatpush3.bf16.msra.mxu1 %v458_v49 }
 0x12c   :  { %v362_v51 = vpop.f32.mrb[0].mxu0 }
 0x12d   :  { %v159_v52 = vadd.f32 %v362_v51, %v290_v50  ;;  %v153_v53 = vpop.f32.mrb[1].mxu0 }
 0x12e   :  { %v154_v54 = vadd.f32 %v290_v50, %v153_v53 }
 0x12f   :  { %v165_v55 = vmul.f32 0.70710677, %v159_v52  ;;  %v163_v62 = vmul.f32 0.5, %v159_v52 }
 0x130   :  { %v164_v56 = vmul.f32 0.70710677, %v154_v54  ;;  %v162_v60 = vmul.f32 0.5, %v154_v54 }
 0x131   :  { %468 = verf.f32 %v165_v55 }
 0x132   :  { %470 = verf.f32 %v164_v56 }
 0x13b   :  { %v469_v57 = vpop.eup %468 }
 0x13c   :  { %v471_v58 = vpop.eup %470  ;;  %v169_v59 = vadd.f32 1.0, %v469_v57 }
 0x13d   :  { %v168_v61 = vadd.f32 1.0, %v471_v58 }
 0x13e   :  { %v171_v0 = vmul.f32 %v169_v59, %v163_v62 }
 0x13f   :  { %v170_v63 = vmul.f32 %v168_v61, %v162_v60 }
 0x141   :  { %395 = vmatprep.mubr.f32.mxu1 %v170_v63 }
 0x142   :  { %396 = vmatmul.mubr.f32.vlgmr.msra.gmra.mrb[0].mxu1 %v171_v0 }
 0x215   :  { %v397_v2 = vpop.f32.mrb[0].mxu1 }
 0x216   :  { %v267_v3 = vadd.f32 %v397_v2, %v291_v1  ;;  %v261_v4 = vpop.f32.mrb[1].mxu1 }
 0x217   :  { %v262_v5 = vadd.f32 %v291_v1, %v261_v4 }
 0x218   :  { %271 = vst [vmem:[#allocation8 + $0x8] sm:$0xff] %v267_v3 }
 0x219   :  { %270 = vst [vmem:[#allocation8] sm:$0xff] %v262_v5 }
 0x21a   :  { %549 = shalt.err (!%p546_p0)
}
 0x21b   :  { %s550_s4 = scalar_lea.hbm %s680_s5, 256 }
 0x21c   :  { %p551_p1 = scmp.ne.s32.totalorder %s680_s5, %s550_s4  ;;  %p554_p2 = scmp.lt.u32.totalorder %s550_s4, %s680_s5 }
 0x21e   :  { %p556_p3 = pnand %p554_p2, %p551_p1 }
 0x220   :  { %559 = shalt.err (!%p556_p3)
}
 0x221   :  { %283 = dma.vmem_to_hbm [thread:$0]  %s278_s9, 256, %s680_s5, [#allocation4], %s568_s30, %s568_s30, %s569_s6  }
 0x222   :  { %564 = dma.done.wait [#allocation4], 256  }
 0x223   :  { %565 = vsyncadd [#allocation4], 4294967040 }
 0x224   :  { %287 = vsyncpa [#allocation3], 1 }
 0x225   :  { %288 = vsyncpa [#allocation6], 1 }
 0x226   :  { %289 = vsyncpa [#allocation4], 1 }

</bundles_post_ra>
